<compile_context>
chip_gen: v6e
topology: v6e:2x2x1
jax: 0.10.0
libtpu: 0.0.40
codegen_flags: <defaults>
</compile_context>

<pallas_src>
import functools
import math

import jax
import jax.numpy as jnp
from jax.experimental import pallas as pl
from jax.experimental.pallas import tpu as pltpu


# ----------------------------- tuning knobs ---------------------------------

# Matmul operand dtype fed to the MXU (accumulation is always f32 via
# preferred_element_type).  bf16 doubles MXU throughput on v6e/v7x and is the
# standard TPU practice; set to jnp.float32 for bit-closer parity with PyTorch.
MXU_DTYPE = jnp.bfloat16

# Preferred tile sizes (v6e defaults).  v5e: 128-aligned tiles are enough
# (4x128x128 MXU); v7x: shrink TK (or pipeline depth) to respect 64 MiB VMEM.
TM = 256     # row tile (sublane axis, multiple of 8)
TN = 256     # col tile (lane axis, multiple of 128)
TK = 512     # contraction tile


def _pick_tile(dim, preferred, align):
    """Largest tile <= preferred that is a multiple of `align` and divides dim.
    Falls back to the full dim (always a legal BlockSpec block)."""
    if dim <= preferred:
        return dim
    t = (preferred // align) * align
    while t >= align:
        if dim % t == 0:
            return t
        t -= align
    return dim  # TODO(synk): pad non-divisible dims instead of a full-dim block.


# ----------------------------- in-kernel math --------------------------------

_INV_SQRT2 = 0.7071067811865476


def _erf(x):
    # Abramowitz & Stegun 7.1.26 rational approximation (|err| < 1.5e-7).
    a1, a2, a3, a4, a5 = (0.254829592, -0.284496736, 1.421413741,
                          -1.453152027, 1.061405429)
    p = 0.3275911
    s = jnp.where(x >= 0.0, 1.0, -1.0)
    ax = jnp.abs(x)
    t = 1.0 / (1.0 + p * ax)
    poly = ((((a5 * t + a4) * t + a3) * t + a2) * t + a1) * t
    return s * (1.0 - poly * jnp.exp(-ax * ax))


def _gelu(x):
    # erf-based GELU, matching HuggingFace "gelu" activation.
    return 0.5 * x * (1.0 + _erf(x * _INV_SQRT2))


def _ln(x, g, b, eps):
    mu = jnp.mean(x, axis=-1, keepdims=True)
    xc = x - mu
    var = jnp.mean(xc * xc, axis=-1, keepdims=True)
    return xc * jax.lax.rsqrt(var + eps) * g + b


# --------------------- fused tiled linear (+gelu/+res/+LN) -------------------

def _linear_kernel(*refs, activation, eps, has_residual, has_ln, n_k):
    x_ref, w_ref, b_ref = refs[0], refs[1], refs[2]
    p = 3
    if has_residual:
        r_ref = refs[p]
        p += 1
    if has_ln:
        g_ref, beta_ref = refs[p], refs[p + 1]
        p += 2
    o_ref, acc_ref = refs[p], refs[p + 1]

    kk = pl.program_id(2)

    @pl.when(kk == 0)
    def _():
        acc_ref[...] = jnp.zeros_like(acc_ref)

    acc_ref[...] += jnp.dot(
        x_ref[...].astype(MXU_DTYPE), w_ref[...].astype(MXU_DTYPE),
        preferred_element_type=jnp.float32)

    @pl.when(kk == n_k - 1)
    def _():
        y = acc_ref[...] + b_ref[...].astype(jnp.float32)
        if activation == "gelu":
            y = _gelu(y)
        if has_residual:
            y = y + r_ref[...].astype(jnp.float32)
        if has_ln:
            y = _ln(y, g_ref[...].astype(jnp.float32),
                    beta_ref[...].astype(jnp.float32), eps)
        o_ref[...] = y.astype(o_ref.dtype)


def fused_linear(x, w, b, *, activation=None, residual=None, ln=None, eps=1e-12):
    """y = x @ w + b, optional GELU, optional (+residual -> LayerNorm) epilogue.

    PyTorch nn.Linear semantics with weight stored as (in, out).
    When residual/ln are given the full feature width is one tile (LN needs it).
    """
    m, k = x.shape
    n = w.shape[1]
    has_res = residual is not None
    has_ln = ln is not None

    tm = _pick_tile(m, TM, 8)
    tk = _pick_tile(k, TK, 128)
    tn = n if (has_res or has_ln) else _pick_tile(n, TN, 128)
    n_m, n_n, n_k = m // tm, n // tn, k // tk

    in_specs = [
        pl.BlockSpec((tm, tk), lambda i, j, kk: (i, kk)),
        pl.BlockSpec((tk, tn), lambda i, j, kk: (kk, j)),
        pl.BlockSpec((1, tn), lambda i, j, kk: (0, j)),
    ]
    args = [x, w, b.reshape(1, n)]
    if has_res:
        in_specs.append(pl.BlockSpec((tm, tn), lambda i, j, kk: (i, j)))
        args.append(residual)
    if has_ln:
        g, beta = ln
        in_specs.append(pl.BlockSpec((1, tn), lambda i, j, kk: (0, j)))
        in_specs.append(pl.BlockSpec((1, tn), lambda i, j, kk: (0, j)))
        args.extend([g.reshape(1, n), beta.reshape(1, n)])

    kernel = functools.partial(_linear_kernel, activation=activation, eps=eps,
                               has_residual=has_res, has_ln=has_ln, n_k=n_k)
    return pl.pallas_call(
        kernel,
        out_shape=jax.ShapeDtypeStruct((m, n), jnp.float32),
        grid=(n_m, n_n, n_k),
        in_specs=in_specs,
        out_specs=pl.BlockSpec((tm, tn), lambda i, j, kk: (i, j)),
        scratch_shapes=[pltpu.VMEM((tm, tn), jnp.float32)],
        compiler_params=pltpu.CompilerParams(
            dimension_semantics=("parallel", "parallel", "arbitrary")),
    )(*args)


# --------------------- embeddings: add pos/type + LayerNorm ------------------

def _embed_ln_kernel(x_ref, pos_ref, tok_ref, g_ref, b_ref, o_ref, *, eps):
    x = (x_ref[0].astype(jnp.float32) + pos_ref[...].astype(jnp.float32)
         + tok_ref[...].astype(jnp.float32))
    o_ref[0] = _ln(x, g_ref[...], b_ref[...], eps).astype(o_ref.dtype)


def embed_layernorm(x, pos, tok, g, b, eps):
    B, S, E = x.shape
    ts = _pick_tile(S, TM, 8)
    return pl.pallas_call(
        functools.partial(_embed_ln_kernel, eps=eps),
        out_shape=jax.ShapeDtypeStruct((B, S, E), jnp.float32),
        grid=(B, S // ts),
        in_specs=[
            pl.BlockSpec((1, ts, E), lambda bb, s: (bb, s, 0)),
            pl.BlockSpec((ts, E), lambda bb, s: (s, 0)),
            pl.BlockSpec((1, E), lambda bb, s: (0, 0)),
            pl.BlockSpec((1, E), lambda bb, s: (0, 0)),
            pl.BlockSpec((1, E), lambda bb, s: (0, 0)),
        ],
        out_specs=pl.BlockSpec((1, ts, E), lambda bb, s: (bb, s, 0)),
        compiler_params=pltpu.CompilerParams(
            dimension_semantics=("parallel", "parallel")),
    )(x, pos, tok.reshape(1, E), g.reshape(1, E), b.reshape(1, E))


# ------------------------------ self-attention -------------------------------

def _attention_kernel(qkv_ref, bias_ref, o_ref, *, n_heads, head_dim, scale):
    H = n_heads * head_dim
    qkv = qkv_ref[...].astype(jnp.float32)       # (S, 3H) fused Q|K|V
    bias = bias_ref[0].astype(jnp.float32)       # (1, S) additive key mask
    outs = []
    for h in range(n_heads):                     # static unroll over heads
        q = qkv[:, h * head_dim:(h + 1) * head_dim]
        k = qkv[:, H + h * head_dim:H + (h + 1) * head_dim]
        v = qkv[:, 2 * H + h * head_dim:2 * H + (h + 1) * head_dim]
        s = jax.lax.dot_general(
            q.astype(MXU_DTYPE), k.astype(MXU_DTYPE),
            (((1,), (1,)), ((), ())),
            preferred_element_type=jnp.float32) * scale + bias     # (S, S)
        s = s - jnp.max(s, axis=-1, keepdims=True)
        p = jnp.exp(s)
        p = p * pl.reciprocal(jnp.sum(p, axis=-1, keepdims=True), approx=True)
        outs.append(jnp.dot(p.astype(MXU_DTYPE), v.astype(MXU_DTYPE),
                            preferred_element_type=jnp.float32))
    # single lane-dense store of the merged heads
    o_ref[...] = jnp.concatenate(outs, axis=-1).astype(o_ref.dtype)


def attention(qkv, bias, *, batch, seq, n_heads, head_dim):
    """qkv: (B*S, 3H) fused projections; bias: (B, 1, S). Returns (B*S, H)."""
    # TODO(synk): for very long sequences flash-tile the KV axis instead of the
    # full (S, S) score matrix per head.
    H = n_heads * head_dim
    return pl.pallas_call(
        functools.partial(_attention_kernel, n_heads=n_heads,
                          head_dim=head_dim, scale=1.0 / math.sqrt(head_dim)),
        out_shape=jax.ShapeDtypeStruct((batch * seq, H), jnp.float32),
        grid=(batch,),
        in_specs=[
            pl.BlockSpec((seq, 3 * H), lambda bb: (bb, 0)),
            pl.BlockSpec((1, 1, seq), lambda bb: (bb, 0, 0)),
        ],
        out_specs=pl.BlockSpec((seq, H), lambda bb: (bb, 0)),
        compiler_params=pltpu.CompilerParams(dimension_semantics=("parallel",)),
    )(qkv, bias)


# ------------------ LM head + masked CE (vocab-streaming) --------------------

def _lmhead_ce_kernel(g_ref, w_ref, b_ref, lab_ref,
                      logits_ref, lse_ref, loss_ref,
                      m_scr, l_scr, t_scr, *, n_v, tn):
    v = pl.program_id(1)

    @pl.when(v == 0)
    def _():
        m_scr[...] = jnp.full_like(m_scr, -jnp.inf)
        l_scr[...] = jnp.zeros_like(l_scr)
        t_scr[...] = jnp.zeros_like(t_scr)

    logits = jnp.dot(g_ref[...].astype(MXU_DTYPE), w_ref[...].astype(MXU_DTYPE),
                     preferred_element_type=jnp.float32)
    logits = logits + b_ref[...].astype(jnp.float32)
    logits_ref[...] = logits.astype(logits_ref.dtype)

    # online logsumexp over vocab tiles
    m_prev = m_scr[...]
    m_new = jnp.maximum(m_prev, jnp.max(logits, axis=-1, keepdims=True))
    l_scr[...] = (l_scr[...] * jnp.exp(m_prev - m_new)
                  + jnp.sum(jnp.exp(logits - m_new), axis=-1, keepdims=True))
    m_scr[...] = m_new

    # target logit via in-kernel iota == label (no dense one-hot in HBM)
    labels = lab_ref[...]                                          # (tm, 1) i32
    cols = v * tn + jax.lax.broadcasted_iota(jnp.int32, logits.shape, 1)
    t_scr[...] += jnp.sum(jnp.where(cols == labels, logits, 0.0),
                          axis=-1, keepdims=True)

    @pl.when(v == n_v - 1)
    def _():
        lse = m_scr[...] + jnp.log(l_scr[...])
        valid = (lab_ref[...] != -100).astype(jnp.float32)
        lse_ref[...] = lse
        loss_ref[...] = (lse - t_scr[...]) * valid


def lm_head_with_loss(g, w, b, labels):
    """Returns (logits (M,V), per-row logsumexp (M,1), masked per-row CE (M,1))."""
    m, e = g.shape
    vocab = w.shape[1]
    tm = _pick_tile(m, TM, 8)
    tn = _pick_tile(vocab, TN, 128)
    n_m, n_v = m // tm, vocab // tn
    labels2 = labels.reshape(m, 1).astype(jnp.int32)
    return pl.pallas_call(
        functools.partial(_lmhead_ce_kernel, n_v=n_v, tn=tn),
        out_shape=(
            jax.ShapeDtypeStruct((m, vocab), jnp.float32),   # logits
            jax.ShapeDtypeStruct((m, 1), jnp.float32),       # logsumexp per row
            jax.ShapeDtypeStruct((m, 1), jnp.float32),       # masked row loss
        ),
        grid=(n_m, n_v),
        in_specs=[
            pl.BlockSpec((tm, e), lambda i, v: (i, 0)),
            pl.BlockSpec((e, tn), lambda i, v: (0, v)),
            pl.BlockSpec((1, tn), lambda i, v: (0, v)),
            pl.BlockSpec((tm, 1), lambda i, v: (i, 0)),
        ],
        out_specs=(
            pl.BlockSpec((tm, tn), lambda i, v: (i, v)),
            pl.BlockSpec((tm, 1), lambda i, v: (i, 0)),
            pl.BlockSpec((tm, 1), lambda i, v: (i, 0)),
        ),
        scratch_shapes=[pltpu.VMEM((tm, 1), jnp.float32)] * 3,
        compiler_params=pltpu.CompilerParams(
            dimension_semantics=("parallel", "arbitrary")),
    )(g, w, b.reshape(1, vocab), labels2)


def _softmax_from_lse_kernel(logits_ref, lse_ref, o_ref):
    o_ref[...] = jnp.exp(
        logits_ref[...].astype(jnp.float32) - lse_ref[...]).astype(o_ref.dtype)


def softmax_from_lse(logits, lse):
    m, vocab = logits.shape
    tm = _pick_tile(m, TM, 8)
    tn = _pick_tile(vocab, TN, 128)
    return pl.pallas_call(
        _softmax_from_lse_kernel,
        out_shape=jax.ShapeDtypeStruct((m, vocab), jnp.float32),
        grid=(m // tm, vocab // tn),
        in_specs=[pl.BlockSpec((tm, tn), lambda i, v: (i, v)),
                  pl.BlockSpec((tm, 1), lambda i, v: (i, 0))],
        out_specs=pl.BlockSpec((tm, tn), lambda i, v: (i, v)),
        compiler_params=pltpu.CompilerParams(
            dimension_semantics=("parallel", "parallel")),
    )(logits, lse)


def _loss_reduce_kernel(row_loss_ref, lab_ref, o_ref):
    total = jnp.sum(row_loss_ref[...], axis=0, keepdims=True)               # (1,1)
    count = jnp.sum((lab_ref[...] != -100).astype(jnp.float32),
                    axis=0, keepdims=True)                                   # (1,1)
    # mean over non-ignored labels (ignore_index=-100); guard the all-ignored
    # case (reference would be NaN) -> loss 0, exact otherwise.
    o_ref[...] = total / jnp.maximum(count, 1.0)


def reduce_loss(row_loss, labels):
    m = row_loss.shape[0]
    return pl.pallas_call(
        _loss_reduce_kernel,
        out_shape=jax.ShapeDtypeStruct((1, 1), jnp.float32),
        grid=(1,),
        in_specs=[pl.BlockSpec((m, 1), lambda i: (0, 0)),
                  pl.BlockSpec((m, 1), lambda i: (0, 0))],
        out_specs=pl.BlockSpec((1, 1), lambda i: (0, 0)),
    )(row_loss, labels.reshape(m, 1).astype(jnp.int32))


# ------------------------------- model glue ----------------------------------

def init_params(key, cfg):
    E, H, V = cfg["embedding_size"], cfg["hidden_size"], cfg["vocab_size"]
    I, L, P = (cfg["intermediate_size"], cfg["num_hidden_layers"],
               cfg["max_position_embeddings"])
    keys = iter(jax.random.split(key, 64))

    def w(shape):
        return jax.random.normal(next(keys), shape, jnp.float32) * 0.02

    params = {
        # nn.Embedding weight is replaced by the provided `embeddings` parameter
        # (padding row is NOT re-zeroed), so a plain random table is faithful.
        "embed_weight": w((V, E)),
        "pos_embed": w((P, E)),
        "tok_type_embed": w((2, E)),
        "emb_ln_g": jnp.ones((E,), jnp.float32), "emb_ln_b": jnp.zeros((E,), jnp.float32),
        "proj_w": w((E, H)), "proj_b": jnp.zeros((H,), jnp.float32),
        "gp_dense_w": w((H, E)), "gp_dense_b": jnp.zeros((E,), jnp.float32),
        "gp_ln_g": jnp.ones((E,), jnp.float32), "gp_ln_b": jnp.zeros((E,), jnp.float32),
        "lm_w": w((E, V)), "lm_b": jnp.zeros((V,), jnp.float32),
        "layers": [],
    }
    for _ in range(L):
        params["layers"].append({
            "q_w": w((H, H)), "q_b": jnp.zeros((H,), jnp.float32),
            "k_w": w((H, H)), "k_b": jnp.zeros((H,), jnp.float32),
            "v_w": w((H, H)), "v_b": jnp.zeros((H,), jnp.float32),
            "attn_out_w": w((H, H)), "attn_out_b": jnp.zeros((H,), jnp.float32),
            "attn_ln_g": jnp.ones((H,), jnp.float32), "attn_ln_b": jnp.zeros((H,), jnp.float32),
            "inter_w": w((H, I)), "inter_b": jnp.zeros((I,), jnp.float32),
            "out_w": w((I, H)), "out_b": jnp.zeros((H,), jnp.float32),
            "out_ln_g": jnp.ones((H,), jnp.float32), "out_ln_b": jnp.zeros((H,), jnp.float32),
        })
    return params


def electra_generator_forward(params, data, attention_mask, labels, cfg):
    B, S = data.shape
    E, H, V = cfg["embedding_size"], cfg["hidden_size"], cfg["vocab_size"]
    nH = cfg["num_attention_heads"]
    Dh = H // nH
    eps = cfg["layer_norm_eps"]
    M = B * S

    # ---- self.embed_layer(data): token-id gather (XLA glue) ----
    x = jnp.take(params["embed_weight"], data, axis=0)                  # (B, S, E)

    # ---- ElectraEmbeddings (inputs_embeds path): +pos +token_type -> LN ----
    emb = embed_layernorm(x, params["pos_embed"][:S], params["tok_type_embed"][0],
                          params["emb_ln_g"], params["emb_ln_b"], eps)   # (B,S,E)
    h = emb.reshape(M, E)

    # ---- embeddings_project (embedding_size != hidden_size) ----
    h = fused_linear(h, params["proj_w"], params["proj_b"])             # (M, H)

    # ---- extended attention mask: (1 - mask) * -10000 added to scores ----
    bias = ((1.0 - attention_mask.astype(jnp.float32)) * -10000.0).reshape(B, 1, S)

    # ---- ElectraEncoder layers ----
    for lp in params["layers"]:
        wqkv = jnp.concatenate([lp["q_w"], lp["k_w"], lp["v_w"]], axis=1)   # (H,3H)
        bqkv = jnp.concatenate([lp["q_b"], lp["k_b"], lp["v_b"]])
        qkv = fused_linear(h, wqkv, bqkv)                                    # (M,3H)
        ctx = attention(qkv, bias, batch=B, seq=S, n_heads=nH, head_dim=Dh)  # (M,H)
        h = fused_linear(ctx, lp["attn_out_w"], lp["attn_out_b"],
                         residual=h, ln=(lp["attn_ln_g"], lp["attn_ln_b"]), eps=eps)
        inter = fused_linear(h, lp["inter_w"], lp["inter_b"], activation="gelu")
        h = fused_linear(inter, lp["out_w"], lp["out_b"],
                         residual=h, ln=(lp["out_ln_g"], lp["out_ln_b"]), eps=eps)

    # ---- generator_predictions: dense -> gelu -> LayerNorm (fused) ----
    g = fused_linear(h, params["gp_dense_w"], params["gp_dense_b"],
                     activation="gelu", ln=(params["gp_ln_g"], params["gp_ln_b"]),
                     eps=eps)                                            # (M, E)

    # ---- generator_lm_head + masked-LM CE (ignore_index=-100), fused ----
    logits, lse, row_loss = lm_head_with_loss(g, params["lm_w"], params["lm_b"],
                                              labels)
    loss = reduce_loss(row_loss, labels)[0, 0]

    # ---- self.softmax(logits) over vocab, reusing the streamed logsumexp ----
    scores = softmax_from_lse(logits, lse).reshape(B, S, V)
    return loss, scores


# ----------------------------------- main ------------------------------------

if __name__ == "__main__":
    cfg = dict(
        vocab_size=32,
        embedding_size=16,
        hidden_size=32,
        num_hidden_layers=2,
        num_attention_heads=2,
        intermediate_size=64,
        max_position_embeddings=16,
        layer_norm_eps=1e-12,
    )
    key = jax.random.PRNGKey(0)
    pkey, dkey, lkey, mkey = jax.random.split(key, 4)

    params = init_params(pkey, cfg)

    B, S = 2, 8
    data = jax.random.randint(dkey, (B, S), 0, cfg["vocab_size"], dtype=jnp.int32)
    attention_mask = jnp.ones((B, S), jnp.int32).at[1, 6:].set(0)
    # MLM-style labels: ~25% positions carry a target, rest -100 (ignored).
    label_tokens = jax.random.randint(lkey, (B, S), 0, cfg["vocab_size"], dtype=jnp.int32)
    mask_positions = jax.random.uniform(mkey, (B, S)) < 0.25
    labels = jnp.where(mask_positions, label_tokens, -100).astype(jnp.int32)
    labels = labels.at[0, 0].set(label_tokens[0, 0])   # guarantee >=1 valid label

    loss, scores = electra_generator_forward(params, data, attention_mask, labels, cfg)
    jax.block_until_ready((loss, scores))

    assert scores.shape == (B, S, cfg["vocab_size"])
    assert loss.shape == ()
    assert bool(jnp.isfinite(loss))
    print("KERNEL_OK")
</pallas_src>

<mosaic_0001>
module attributes {stable_mosaic.version = 11 : i64} {
  func.func @_embed_ln_kernel(%arg0: i32, %arg1: i32, %arg2: memref<1x8x16xf32, #tpu.memory_space<vmem>>, %arg3: memref<8x16xf32, #tpu.memory_space<vmem>>, %arg4: memref<1x16xf32, #tpu.memory_space<vmem>>, %arg5: memref<1x16xf32, #tpu.memory_space<vmem>>, %arg6: memref<1x16xf32, #tpu.memory_space<vmem>>, %arg7: memref<1x8x16xf32, #tpu.memory_space<vmem>>) attributes {dimension_semantics = [#tpu.dimension_semantics<parallel>, #tpu.dimension_semantics<parallel>], iteration_bounds = array<i64: 2, 1>, scalar_prefetch = 0 : i64, scratch_operands = 0 : i64, tpu.core_type = #tpu.core_type<tc>, window_params = [{transform_indices = @transform_0, window_bounds = array<i64: 1, 8, 16>}, {transform_indices = @transform_1, window_bounds = array<i64: 8, 16>}, {pipeline_mode = #tpu.pipeline_mode<synchronous>, transform_indices = @transform_2, window_bounds = array<i64: 1, 16>}, {pipeline_mode = #tpu.pipeline_mode<synchronous>, transform_indices = @transform_3, window_bounds = array<i64: 1, 16>}, {pipeline_mode = #tpu.pipeline_mode<synchronous>, transform_indices = @transform_4, window_bounds = array<i64: 1, 16>}, {transform_indices = @transform_5, window_bounds = array<i64: 1, 8, 16>}]} {
    %c0 = arith.constant 0 : index
    %c0_0 = arith.constant 0 : index
    %c0_1 = arith.constant 0 : index
    %0 = vector.load %arg2[%c0, %c0_0, %c0_1] : memref<1x8x16xf32, #tpu.memory_space<vmem>>, vector<1x8x16xf32>
    %1 = vector.shape_cast %0 : vector<1x8x16xf32> to vector<8x16xf32>
    %c0_2 = arith.constant 0 : index
    %c0_3 = arith.constant 0 : index
    %2 = vector.load %arg3[%c0_2, %c0_3] : memref<8x16xf32, #tpu.memory_space<vmem>>, vector<8x16xf32>
    %3 = arith.addf %1, %2 : vector<8x16xf32>
    %c0_4 = arith.constant 0 : index
    %c0_5 = arith.constant 0 : index
    %4 = vector.load %arg4[%c0_4, %c0_5] : memref<1x16xf32, #tpu.memory_space<vmem>>, vector<1x16xf32>
    %5 = vector.broadcast %4 : vector<1x16xf32> to vector<8x16xf32>
    %6 = arith.addf %3, %5 : vector<8x16xf32>
    %c0_6 = arith.constant 0 : index
    %c0_7 = arith.constant 0 : index
    %7 = vector.load %arg5[%c0_6, %c0_7] : memref<1x16xf32, #tpu.memory_space<vmem>>, vector<1x16xf32>
    %c0_8 = arith.constant 0 : index
    %c0_9 = arith.constant 0 : index
    %8 = vector.load %arg6[%c0_8, %c0_9] : memref<1x16xf32, #tpu.memory_space<vmem>>, vector<1x16xf32>
    %cst = arith.constant dense<0.000000e+00> : vector<8xf32>
    %9 = vector.multi_reduction <add>, %6, %cst [1] : vector<8x16xf32> to vector<8xf32>
    %10 = vector.shape_cast %9 : vector<8xf32> to vector<8x1xf32>
    %cst_10 = arith.constant 1.600000e+01 : f32
    %11 = vector.broadcast %cst_10 : f32 to vector<8x1xf32>
    %12 = arith.divf %10, %11 : vector<8x1xf32>
    %13 = vector.broadcast %12 : vector<8x1xf32> to vector<8x16xf32>
    %14 = arith.subf %6, %13 : vector<8x16xf32>
    %15 = arith.mulf %14, %14 : vector<8x16xf32>
    %cst_11 = arith.constant dense<0.000000e+00> : vector<8xf32>
    %16 = vector.multi_reduction <add>, %15, %cst_11 [1] : vector<8x16xf32> to vector<8xf32>
    %17 = vector.shape_cast %16 : vector<8xf32> to vector<8x1xf32>
    %cst_12 = arith.constant 1.600000e+01 : f32
    %18 = vector.broadcast %cst_12 : f32 to vector<8x1xf32>
    %19 = arith.divf %17, %18 : vector<8x1xf32>
    %cst_13 = arith.constant 9.99999996E-13 : f32
    %20 = vector.broadcast %cst_13 : f32 to vector<8x1xf32>
    %21 = arith.addf %19, %20 : vector<8x1xf32>
    %22 = math.rsqrt %21 : vector<8x1xf32>
    %23 = vector.broadcast %22 : vector<8x1xf32> to vector<8x16xf32>
    %24 = arith.mulf %14, %23 : vector<8x16xf32>
    %25 = vector.broadcast %7 : vector<1x16xf32> to vector<8x16xf32>
    %26 = arith.mulf %24, %25 : vector<8x16xf32>
    %27 = vector.broadcast %8 : vector<1x16xf32> to vector<8x16xf32>
    %28 = arith.addf %26, %27 : vector<8x16xf32>
    %c0_14 = arith.constant 0 : index
    %c0_15 = arith.constant 0 : index
    %c0_16 = arith.constant 0 : index
    %29 = vector.load %arg7[%c0_14, %c0_15, %c0_16] : memref<1x8x16xf32, #tpu.memory_space<vmem>>, vector<1x8x16xf32>
    %30 = vector.shape_cast %29 : vector<1x8x16xf32> to vector<8x16xf32>
    %31 = vector.shape_cast %28 : vector<8x16xf32> to vector<1x8x16xf32>
    tpu.vector_store %arg7[%c0_14, %c0_15, %c0_16], %31 {strides = array<i32>} : memref<1x8x16xf32, #tpu.memory_space<vmem>>, vector<1x8x16xf32>,
    return
  }
  func.func @transform_0(%arg0: i32, %arg1: i32) -> (i32, i32, i32) {
    %c0_i32 = arith.constant 0 : i32
    %c0_i32_0 = arith.constant 0 : i32
    return %arg0, %arg1, %c0_i32 : i32, i32, i32
  }
  func.func @transform_1(%arg0: i32, %arg1: i32) -> (i32, i32) {
    %c0_i32 = arith.constant 0 : i32
    %c0_i32_0 = arith.constant 0 : i32
    return %arg1, %c0_i32 : i32, i32
  }
  func.func @transform_2(%arg0: i32, %arg1: i32) -> (i32, i32) {
    %c0_i32 = arith.constant 0 : i32
    %c0_i32_0 = arith.constant 0 : i32
    %c0_i32_1 = arith.constant 0 : i32
    return %c0_i32, %c0_i32_0 : i32, i32
  }
  func.func @transform_3(%arg0: i32, %arg1: i32) -> (i32, i32) {
    %c0_i32 = arith.constant 0 : i32
    %c0_i32_0 = arith.constant 0 : i32
    %c0_i32_1 = arith.constant 0 : i32
    return %c0_i32, %c0_i32_0 : i32, i32
  }
  func.func @transform_4(%arg0: i32, %arg1: i32) -> (i32, i32) {
    %c0_i32 = arith.constant 0 : i32
    %c0_i32_0 = arith.constant 0 : i32
    %c0_i32_1 = arith.constant 0 : i32
    return %c0_i32, %c0_i32_0 : i32, i32
  }
  func.func @transform_5(%arg0: i32, %arg1: i32) -> (i32, i32, i32) {
    %c0_i32 = arith.constant 0 : i32
    %c0_i32_0 = arith.constant 0 : i32
    return %arg0, %arg1, %c0_i32 : i32, i32, i32
  }
}

</mosaic_0001>

<bundles_post_ra>
// kernel: tpu_custom_call.1
= control target key start
LH: loop header
LB: loop body
LE: loop exit
PB: predicated region body
PF: predicated region fallthrough
CT: control target
= control target key end

     0   :  { %s870_s0 = inlined_call_operand.hbm [shape: f32[2,8,16], index: 0, kind: input, shape index: {}]   ;;  %s871_s1 = inlined_call_operand.hbm [shape: f32[8,16], index: 1, kind: input, shape index: {}]   ;;  %s872_s2 = inlined_call_operand.vmem [shape: f32[1,16], index: 2, kind: input, shape index: {}]   ;;  %s873_s3 = inlined_call_operand.vmem [shape: f32[1,16], index: 3, kind: input, shape index: {}]   ;;  %s874_s4 = inlined_call_operand.vmem [shape: f32[1,16], index: 4, kind: input, shape index: {}]   ;;  %s875_s5 = inlined_call_operand.hbm [shape: f32[2,8,16], index: 5, kind: output, shape index: {}]  }
   0x1   :  { %877 = sst [smem:[#allocation11_spill]] %s871_s1 }
   0x2   :  { %10 = vsyncpa [#allocation3], 0 }
   0x3   :  { %12 = vsyncpa [#allocation3 + $0x1], 0 }
   0x4   :  { %13 = vsyncpa [#allocation6], 0 }
   0x5   :  { %14 = vsyncpa [#allocation4], 0 }
   0x6   :  { %16 = vsyncpa [#allocation4 + $0x1], 0  ;;  %s693_s18 = smov 0   ;;  %s695_s19 = smov 0  }
   0x7   :  { %s697_s20 = smov 0   ;;  %s699_s21 = smov 0  }
   0x8   :  { %s701_s22 = smov 0   ;;  %s703_s23 = smov 0  }
   0x9 LB: > { %s427_s24 = sadd.s32 4294967295, %s658_s23   ;;  %s428_s25 = sadd.s32 4294967294, %s658_s23   ;;  %s658_s23 = sphi %s703_s23, %s22_s23   ;;  %s654_s22 = sphi %s701_s22, %s894_s22   ;;  %s650_s21 = sphi %s699_s21, %s893_s21   ;;  %s646_s20 = sphi %s697_s20, %s892_s20   ;;  %s642_s19 = sphi %s695_s19, %s891_s19   ;;  %s638_s18 = sphi %s693_s18, %s890_s18  }
   0xa   : > { %p56_p0 = scmp.ne.s32.totalorder %s642_s19, %s638_s18  ;;  %p727_p1 = scmp.eq.s32.totalorder %s427_s24, 0 }
   0xb   : > { %p731_p2 = scmp.eq.s32.totalorder %s427_s24, 1  ;;  %p177_p3 = scmp.eq.s32.totalorder %s428_s25, 1 }
   0xc   : > { %p737_p4 = por %p727_p1, %p56_p0  ;;  %p429_p5 = scmp.ge.s32.totalorder %s658_s23, 1 }
   0xd   : > { %p742_p6 = por %p177_p3, %p56_p0  ;;  %p184_p7 = scmp.lt.s32.totalorder %s658_s23, 3 }
   0xe   : > { %s880_s28 = scalar_select %p737_p4, 1, 0 }
   0xf   : > { %s881_s29 = scalar_select %p742_p6, 1, 0 }
  0x10   : > { %p747_p8 = pnand %p429_p5, %p184_p7  ;;  %s660_s6 = smov [#allocation5]  }
  0x11   : > { %s199_s7 = sshll.u32 %s660_s6, 4  ;;  %s34_s9 = sadd.s32 1, %s654_s22  ;;  %s200_s7 = int_to_ptr.vmem [resolvable:$true] %s199_s7 }
  0x12   : > { %p453_p10 = pneg %p747_p8  ;;  %s43_s10 = sadd.s32 1, %s646_s20 }
  0x13   : > { %p36_p12 = scmp.ge.s32.totalorder %s34_s9, 2  ;;  %s531_s11 = scalar_lea.vmem %s200_s7, 128 }
  0x14   : > { %p756_p11 = pnand %p453_p10, %p727_p1  ;;  %p532_p0 = scmp.ne.s32.totalorder %s200_s7, %s531_s11 }
  0x15   : > { %p539_p7 = scmp.lt.s32.totalorder %s200_s7, %s200_s7  ;;  %p540_p6 = scmp.lt.s32.totalorder %s531_s11, %s531_s11 }
  0x16   : > { %p522_p13 = pneg %p756_p11 }
  0x17   : > { %p541_p9 = por %p540_p6, %p539_p7 }
  0x18   : > { %p534_p3 = pnand %p532_p0, %p522_p13 }
  0x1a   : > { %p535_p5 = pneg %p534_p3 }
  0x1c   : > { %p542_p4 = pnand %p541_p9, %p535_p5 }
  0x1e   : > { %545 = shalt.err (!%p542_p4)
}
  0x1f   : > { %s884_s1 = sld [smem:[#allocation11_spill]]  ;;  %s896_s9 = smov (%p36_p12, %s34_s9), 0 }
  0x20   : > { %p50_p6 = scmp.ne.s32.totalorder %s646_s20, %s642_s19  ;;  %p51_p4 = scmp.eq.s32.totalorder %s658_s23, 0 }
  0x21   : > { %s38_s14 = ssub.s32 %s654_s22, %s896_s9  ;;  %p466_p9 = scmp.lt.s32.totalorder %s658_s23, 2 }
  0x22   : > { %p41_p10 = scmp.eq.s32.totalorder %s38_s14, 0  ;;  %p52_p13 = por %p51_p4, %p50_p6 }
  0x23   : > { %p779_p0 = por %p731_p2, %p50_p6  ;;  %s219_s16 = sand.u32 1, %s646_s20  }
  0x24   : > { %s785_s17 = scalar_select %p41_p10, %s646_s20, %s43_s10  }
  0x25   : > { %456 = dma.hbm_to_vmem [thread:$0]  (!%p756_p11), %s884_s1, 128, %s200_s7, [#allocation6]  }
  0x26   : > { %s432_s24 = sshll.u32 %s219_s16, 3  ;;  %s433_s25 = sshll.u32 %s654_s22, 7 }
  0x27   : > { %s229_s8 = scalar_lea.hbm %s870_s0, %s433_s25  ;;  %s223_s11 = scalar_lea.vmem [#allocation2], %s432_s24 }
  0x28   : > { %s231_s12 = sshll.u32 %s223_s11, 4  ;;  %p791_p11 = pnand %p466_p9, %p52_p13  ;;  %s232_s12 = int_to_ptr.vmem [resolvable:$true] %s231_s12 }
  0x29   : > { %s220_s27 = scalar_lea.sflag [#allocation3], %s219_s16  ;;  %s559_s14 = scalar_lea.vmem %s232_s12, 128 }
  0x2a   : > { %p548_p2 = pneg %p791_p11  ;;  %p560_p12 = scmp.ne.s32.totalorder %s232_s12, %s559_s14 }
  0x2b   : > { %s661_s10 = smov [#allocation2]  }
  0x2c   : > { %p562_p3 = pnand %p560_p12, %p548_p2  ;;  %s564_s1 = sshll.u32 %s661_s10, 4  ;;  %s565_s1 = int_to_ptr.vmem [resolvable:$false] %s564_s1 }
  0x2d   : > { %s566_s6 = scalar_lea.vmem %s565_s1, 256  ;;  %p567_p7 = scmp.lt.s32.totalorder %s232_s12, %s565_s1 }
  0x2e   : > { %p563_p5 = pneg %p562_p3  ;;  %p568_p6 = scmp.lt.s32.totalorder %s566_s6, %s559_s14 }
  0x30   : > { %p569_p4 = por %p568_p6, %p567_p7 }
  0x32   : > { %p570_p10 = pnand %p569_p4, %p563_p5 }
  0x34   : > { %573 = shalt.err (!%p570_p10)
}
  0x35   : > { %460 = dma.hbm_to_vmem [thread:$0]  (!%p791_p11), %s229_s8, 128, %s232_s12, %s220_s27  }
  0x36   : > { %240 = sbr.rel (%p747_p8) target bundleno = 388 (0x184), region = 40  ;;  %s802_s16 = sand.u32 (!%p747_p8), 1, %s642_s19  }
  0x37   : > { %s435_s24 = sshll.u32 (!%p747_p8), %s802_s16, 3  ;;  %s243_s25 = scalar_lea.sflag (!%p747_p8), [#allocation3], %s802_s16 }
  0x38   : > { %s246_s1 = scalar_lea.vmem (!%p747_p8), [#allocation2], %s435_s24  ;;  %p887_p9 = scmp.ne.s32.totalorder (!%p747_p8), %s880_s28, 0 }
  0x3b   : > { %625 = dma.done.wait (%p887_p9), %s243_s25, 128  }
  0x3c   : > { %627 = vsyncadd (%p887_p9), %s243_s25, 4294967168 }
  0x3d   : > { %629 = dma.done.wait (%p727_p1), [#allocation6], 128  }
  0x3e   : > { %631 = vsyncadd (%p727_p1), [#allocation6], 4294967168  ;;  %v277_v0 = vld [vmem:[%s246_s1] sm:$0xff]  ;;  %v278_v1 = vld [vmem:[#allocation5] sm:$0xff]  ;;  %vm290_vm0 = vcmask 130048   ;;  %s442_s12 = sshll.u32 %s650_s21, 7 }
  0x3f   : > { %v438_v2 = vld [vmem:[%s872_s2] ss:$0 sm:$0xff]  ;;  %v279_v3 = vadd.f32 %v278_v1, %v277_v0  ;;  %s276_s13 = scalar_lea.vmem [#allocation7], %s435_s24  ;;  %s333_s6 = scalar_lea.hbm %s875_s5, %s442_s12 }
  0x40   : > { %v439_v15 = vld [vmem:[%s873_s3] ss:$0 sm:$0xff]  ;;  %s335_s27 = sshll.u32 %s276_s13, 4  ;;  %s321_s25 = scalar_lea.sflag [#allocation4], %s802_s16  ;;  %s336_s27 = int_to_ptr.vmem [resolvable:$true] %s335_s27 }
  0x41   : > { %v287_v4 = vadd.f32 %v438_v2, %v279_v3  ;;  %v440_v17 = vld [vmem:[%s874_s4] ss:$0 sm:$0xff]  ;;  %s574_s1 = scalar_lea.vmem %s336_s27, 128  ;;  %s662_s30 = smov [#allocation7]  }
  0x42   : > { %p575_p1 = scmp.ne.s32.totalorder %s336_s27, %s574_s1  ;;  %s578_s21 = sshll.u32 %s662_s30, 4  ;;  %s579_s21 = int_to_ptr.vmem [resolvable:$false] %s578_s21 }
  0x43   : > { %v291_v5 = vsel %vm290_vm0, %v287_v4, 0.0  ;;  %s580_s24 = scalar_lea.vmem %s579_s21, 256  ;;  %p581_p11 = scmp.lt.s32.totalorder %s336_s27, %s579_s21 }
  0x44   : > { %292 = vadd.xlane.f32.xlu0 %v291_v5  ;;  %p576_p8 = pnand %p575_p1, %p779_p0  ;;  %p582_p2 = scmp.lt.s32.totalorder %s580_s24, %s574_s1 }
  0x46   : > { %p577_p13 = pneg %p576_p8  ;;  %p583_p12 = por %p582_p2, %p581_p11 }
  0x48   : > { %p584_p3 = pnand %p583_p12, %p577_p13 }
  0xcd   : > { %v293_v6 = vpop.xlane.xlu0 %292 }
  0xce   : > { %v295_v7 = vmul.f32 0.0625, %v293_v6 }
  0xd0   : > { %v296_v8 = vsub.f32 %v287_v4, %v295_v7 }
  0xd2   : > { %v297_v9 = vmul.f32 %v296_v8, %v296_v8 }
  0xd4   : > { %v298_v10 = vsel %vm290_vm0, %v297_v9, 0.0 }
  0xd5   : > { %299 = vadd.xlane.f32.xlu0 %v298_v10 }
 0x15e   : > { %v300_v11 = vpop.xlane.xlu0 %299 }
 0x15f   : > { %v301_v12 = vmul.f32 0.0625, %v300_v11 }
 0x161   : > { %v302_v13 = vadd.f32 1e-12, %v301_v12 }
 0x163   : > { %518 = vrsqrt.f32 %v302_v13 }
 0x170   : > { %v519_v14 = vpop.eup %518 }
 0x171   : > { %v304_v16 = vmul.f32 %v519_v14, %v296_v8 }
 0x173   : > { %v311_v18 = vmul.f32 %v439_v15, %v304_v16 }
 0x175   : > { %v318_v19 = vadd.f32 %v440_v17, %v311_v18 }
 0x177   : > { %319 = vst.msk [vmem:[%s276_s13] sm:$0xff] %vm290_vm0, %v318_v19 }
 0x178   : > { %587 = shalt.err (!%p584_p3)
}
 0x179   : > { %s588_s7 = scalar_lea.hbm %s333_s6, 128  ;;  %s592_s28 = scalar_lea.hbm %s875_s5, 256 }
 0x17a   : > { %p589_p5 = scmp.ne.s32.totalorder %s333_s6, %s588_s7  ;;  %p593_p4 = scmp.lt.s32.totalorder %s333_s6, %s875_s5 }
 0x17b   : > { %p594_p10 = scmp.lt.s32.totalorder %s592_s28, %s588_s7 }
 0x17c   : > { %p590_p7 = pnand %p589_p5, %p779_p0 }
 0x17d   : > { %p595_p9 = por %p594_p10, %p593_p4 }
 0x17e   : > { %p591_p6 = pneg %p590_p7 }
 0x180   : > { %p596_p1 = pnand %p595_p9, %p591_p6 }
 0x182   : > { %599 = shalt.err (!%p596_p1)
}
 0x183   : > { %451 = dma.vmem_to_hbm [thread:$0]  (%p779_p0), %s336_s27, 128, %s333_s6, %s321_s25  }
 0x184 PF: > { %s347_s12 = sand.u32 1, %s638_s18   ;;  %p888_p8 = scmp.ne.s32.totalorder %s881_s29, 0 }
 0x185   : > { %p889_p13 = scmp.ge.s32.totalorder %s658_s23, 2  ;;  %s348_s13 = scalar_lea.sflag [#allocation4], %s347_s12 }
 0x187   : > { %p462_p11 = pnand %p889_p13, %p888_p8 }
 0x189   : > { %p463_p2 = pneg %p462_p11 }
 0x18b   : > { %633 = dma.done.wait (%p463_p2), %s348_s13, 128  }
 0x18c   : > { %635 = vsyncadd (%p463_p2), %s348_s13, 4294967168  ;;  %s22_s23 = sadd.s32 1, %s658_s23   ;;  %s890_s18 = smov %s642_s19 }
 0x18d   : > { %p19_p12 = scmp.ge.s32.totalorder %s22_s23, 4   ;;  %s891_s19 = smov %s646_s20 }
 0x18e   : > { %s892_s20 = smov %s785_s17  ;;  %s893_s21 = smov %s654_s22 }
 0x18f   : > { %s894_s22 = smov %s896_s9  ;;  %21 = sbr.rel (!%p19_p12) target bundleno = 9 (0x9), region = 90 }
 0x194   :  { %353 = vsyncpa [#allocation3], 1 }
 0x195   :  { %355 = vsyncpa [#allocation3 + $0x1], 1 }
 0x196   :  { %356 = vsyncpa [#allocation6], 1 }
 0x197   :  { %357 = vsyncpa [#allocation4], 1 }
 0x198   :  { %359 = vsyncpa [#allocation4 + $0x1], 1 }

</bundles_post_ra>
